<compile_context>
chip_gen: v7x
topology: tpu7x:2x2x1
jax: 0.10.0
libtpu: 0.0.40
codegen_flags: <defaults>
</compile_context>

<pallas_src>
import functools

import jax
import jax.numpy as jnp
from jax import lax
from jax.experimental import pallas as pl
from jax.experimental.pallas import tpu as pltpu

LANES = 128
SUBLANES = 8
TILE_ROWS_MAX = 512  # 512*128*4B = 256 KiB per key tile (double-buffered)


def _keys_kernel(seed_ref, keys_ref, *, num_items):
    """One (tile_rows, 128) tile of random int32 sort keys.

    seed_ref: SMEM (1,) int32
    keys_ref: VMEM (tile_rows, 128) int32
      real candidate slots (global flat index < num_items): key in [1, 2^31)
      padded slots: key = 0 (always lose under top_k-max)
    """
    rows, cols = keys_ref.shape
    tile = pl.program_id(0)

    row_idx = lax.broadcasted_iota(jnp.int32, (rows, cols), 0)
    col_idx = lax.broadcasted_iota(jnp.int32, (rows, cols), 1)
    flat = (tile * rows + row_idx) * cols + col_idx  # global flat index

    # Stateless hash of (seed, flat index): lowbias32-style mixer.
    x = flat.astype(jnp.uint32)
    s = seed_ref[0].astype(jnp.uint32)
    x = x + s * jnp.uint32(0x9E3779B9)
    x = x ^ (x >> 16)
    x = x * jnp.uint32(0x7FEB352D)
    x = x ^ (x >> 15)
    x = x * jnp.uint32(0x846CA68B)
    x = x ^ (x >> 16)

    keys = (x & jnp.uint32(0x7FFFFFFF)).astype(jnp.int32)  # non-negative int32
    keys = jnp.where(flat < num_items, jnp.maximum(keys, 1), 0)
    keys_ref[...] = keys


@functools.partial(
    jax.jit, static_argnames=("rows", "tile_rows", "num_items", "n", "start")
)
def _predict_impl(seed, *, rows, tile_rows, num_items, n, start):
    keys = pl.pallas_call(
        functools.partial(_keys_kernel, num_items=num_items),
        out_shape=jax.ShapeDtypeStruct((rows, LANES), jnp.int32),
        grid=(rows // tile_rows,),
        in_specs=[pl.BlockSpec(memory_space=pltpu.SMEM)],
        out_specs=pl.BlockSpec((tile_rows, LANES), lambda i: (i, 0)),
        compiler_params=pltpu.CompilerParams(
            dimension_semantics=("parallel",)
        ),
    )(seed)

    # Random-key selection: n largest keys = uniform sample w/o replacement.
    _, idx = lax.top_k(keys.reshape(-1), n)
    # Item id is a pure function of the flat index; float32 matches
    # torch.FloatTensor (ids above 2^24 would lose exactness, as in torch).
    return (start + idx).astype(jnp.float32)


class RandomModelPallas:
    """Pallas/TPU analogue of the PyTorch RandomModel."""

    def __init__(self, dims):
        self.start = int(dims[0])
        self.stop = int(dims[1])
        self.num_items = self.stop - self.start
        assert self.num_items > 0
        raw_rows = -(-self.num_items // LANES)
        small_rows = -(-raw_rows // SUBLANES) * SUBLANES
        self.tile_rows = min(TILE_ROWS_MAX, small_rows)
        self.rows = -(-raw_rows // self.tile_rows) * self.tile_rows

    def forward(self):
        # Matches the PyTorch module: forward is a no-op.
        return None

    def predict(self, interactions, seed=0):
        n = int(interactions.shape[0])
        assert n <= self.num_items, "sample larger than population"
        seed_arr = jnp.asarray([seed], dtype=jnp.int32)
        # TODO(synk): host-side random.sample RNG has no Pallas equivalent;
        # the hash-key shuffle + top_k reproduces its distribution, not its
        # exact stream.
        return _predict_impl(
            seed_arr,
            rows=self.rows,
            tile_rows=self.tile_rows,
            num_items=self.num_items,
            n=n,
            start=self.start,
        )


if __name__ == "__main__":
    # Deterministic small example: 256 candidate items with ids [10, 266),
    # 8 "interactions" (only len(interactions) matters for the random model).
    key = jax.random.PRNGKey(0)
    interactions = jax.random.randint(key, (8, 2), 0, 100, dtype=jnp.int32)

    model = RandomModelPallas(dims=[10, 266])
    _ = model.forward()  # no-op, returns None (matches PyTorch forward)

    preds = model.predict(interactions, seed=0)
    preds = jax.block_until_ready(preds)

    # Sanity checks mirroring random.sample semantics.
    assert preds.shape == (interactions.shape[0],)
    assert preds.dtype == jnp.float32
    p = jax.device_get(preds)
    assert len(set(p.tolist())) == len(p)               # without replacement
    assert all(10 <= v < 266 for v in p.tolist())       # within candidate range

    print("KERNEL_OK")
</pallas_src>

<mosaic_0001>
module attributes {stable_mosaic.version = 11 : i64} {
  func.func @_keys_kernel(%arg0: i32, %arg1: memref<1xi32, #tpu.memory_space<smem>>, %arg2: memref<8x128xi32, #tpu.memory_space<vmem>>) attributes {dimension_semantics = [#tpu.dimension_semantics<parallel>], iteration_bounds = array<i64: 1>, scalar_prefetch = 0 : i64, scratch_operands = 0 : i64, tpu.core_type = #tpu.core_type<tc>, window_params = [{transform_indices = @transform_0, window_bounds = array<i64: 1>}, {transform_indices = @transform_1, window_bounds = array<i64: 8, 128>}]} {
    %0 = tpu.iota {dimensions = array<i32: 0>} : vector<8x128xi32>
    %1 = tpu.iota {dimensions = array<i32: 1>} : vector<8x128xi32>
    %c8_i32 = arith.constant 8 : i32
    %2 = arith.muli %arg0, %c8_i32 : i32
    %3 = vector.broadcast %2 : i32 to vector<8x128xi32>
    %4 = arith.addi %3, %0 : vector<8x128xi32>
    %c128_i32 = arith.constant 128 : i32
    %5 = vector.broadcast %c128_i32 : i32 to vector<8x128xi32>
    %6 = arith.muli %4, %5 : vector<8x128xi32>
    %7 = arith.addi %6, %1 : vector<8x128xi32>
    %c0 = arith.constant 0 : index
    %8 = memref.load %arg1[%c0] : memref<1xi32, #tpu.memory_space<smem>>
    %c-1640531527_i32 = arith.constant -1640531527 : i32
    %9 = arith.muli %8, %c-1640531527_i32 : i32
    %10 = vector.broadcast %9 : i32 to vector<8x128xi32>
    %11 = arith.addi %7, %10 : vector<8x128xi32>
    %c16_i32 = arith.constant 16 : i32
    %12 = vector.broadcast %c16_i32 : i32 to vector<8x128xi32>
    %13 = arith.shrui %11, %12 : vector<8x128xi32>
    %14 = arith.xori %11, %13 : vector<8x128xi32>
    %c2146121005_i32 = arith.constant 2146121005 : i32
    %15 = vector.broadcast %c2146121005_i32 : i32 to vector<8x128xi32>
    %16 = arith.muli %14, %15 : vector<8x128xi32>
    %c15_i32 = arith.constant 15 : i32
    %17 = vector.broadcast %c15_i32 : i32 to vector<8x128xi32>
    %18 = arith.shrui %16, %17 : vector<8x128xi32>
    %19 = arith.xori %16, %18 : vector<8x128xi32>
    %c-2073254261_i32 = arith.constant -2073254261 : i32
    %20 = vector.broadcast %c-2073254261_i32 : i32 to vector<8x128xi32>
    %21 = arith.muli %19, %20 : vector<8x128xi32>
    %c16_i32_0 = arith.constant 16 : i32
    %22 = vector.broadcast %c16_i32_0 : i32 to vector<8x128xi32>
    %23 = arith.shrui %21, %22 : vector<8x128xi32>
    %24 = arith.xori %21, %23 : vector<8x128xi32>
    %c2147483647_i32 = arith.constant 2147483647 : i32
    %25 = vector.broadcast %c2147483647_i32 : i32 to vector<8x128xi32>
    %26 = arith.andi %24, %25 : vector<8x128xi32>
    %c256_i32 = arith.constant 256 : i32
    %27 = vector.broadcast %c256_i32 : i32 to vector<8x128xi32>
    %28 = arith.cmpi slt, %7, %27 : vector<8x128xi32>
    %c1_i32 = arith.constant 1 : i32
    %29 = vector.broadcast %c1_i32 : i32 to vector<8x128xi32>
    %30 = arith.maxsi %26, %29 : vector<8x128xi32>
    %c0_i32 = arith.constant 0 : i32
    %31 = vector.broadcast %c0_i32 : i32 to vector<8x128xi32>
    %32 = arith.select %28, %30, %31 : vector<8x128xi1>, vector<8x128xi32>
    %c0_1 = arith.constant 0 : index
    %c0_2 = arith.constant 0 : index
    %33 = vector.load %arg2[%c0_1, %c0_2] : memref<8x128xi32, #tpu.memory_space<vmem>>, vector<8x128xi32>
    tpu.vector_store %arg2[%c0_1, %c0_2], %32 {strides = array<i32>} : memref<8x128xi32, #tpu.memory_space<vmem>>, vector<8x128xi32>,
    return
  }
  func.func @transform_0(%arg0: i32) -> i32 {
    %c0_i32 = arith.constant 0 : i32
    %c0_i32_0 = arith.constant 0 : i32
    return %c0_i32 : i32
  }
  func.func @transform_1(%arg0: i32) -> (i32, i32) {
    %c0_i32 = arith.constant 0 : i32
    %c0_i32_0 = arith.constant 0 : i32
    return %arg0, %c0_i32 : i32, i32
  }
}

</mosaic_0001>

<bundles_post_ra>
// kernel: _predict_impl.1
= control target key start
LH: loop header
LB: loop body
LE: loop exit
PB: predicated region body
PF: predicated region fallthrough
CT: control target
= control target key end

     0   :  { %v9_v0 = vlaneseq  ;;  %s56_s0 = inlined_call_operand.<no memory space> [shape: s32[1], index: 0, kind: input, shape index: {}]   ;;  %s57_s1 = inlined_call_operand.vmem [shape: s32[8,128], index: 1, kind: output, shape index: {}]  }
   0x1   :  { %s19_s8 = smul.u32 2654435769, %s56_s0 }
   0x2   :  { %v10_v1 = vshrl.u32 %v9_v0, 7  ;;  %v12_v2 = vand.u32 127, %v9_v0 }
   0x3   :  { %v20_v4 = vstv %s19_s8 }
   0x4   :  { %v16_v3 = vmul.u32 128, %v10_v1 }
   0x6   :  { %v17_v5 = vadd.s32 %v16_v3, %v12_v2 }
   0x8   :  { %v21_v6 = vadd.s32 %v20_v4, %v17_v5  ;;  %vm31_vm0 = vcmp.lt.s32.totalorder %v17_v5, 256 }
   0xa   :  { %v22_v7 = vshrl.u32 %v21_v6, 16 }
   0xc   :  { %v23_v8 = vxor.u32 %v22_v7, %v21_v6 }
   0xe   :  { %v24_v9 = vmul.u32 2146121005, %v23_v8 }
  0x10   :  { %v25_v10 = vshrl.u32 %v24_v9, 15 }
  0x12   :  { %v26_v11 = vxor.u32 %v25_v10, %v24_v9 }
  0x14   :  { %v27_v12 = vmul.u32 2221713035, %v26_v11 }
  0x16   :  { %v28_v13 = vshrl.u32 %v27_v12, 16 }
  0x18   :  { %v29_v14 = vxor.u32 %v28_v13, %v27_v12 }
  0x1a   :  { %v30_v15 = vand.u32 2147483647, %v29_v14 }
  0x1c   :  { %vm32_vm1 = vcmp.gt.s32.totalorder %v30_v15, 1 }
  0x1d   :  { %v33_v16 = vsel %vm32_vm1, %v30_v15, 1 }
  0x1e   :  { %v34_v17 = vsel %vm31_vm0, %v33_v16, 0 }
  0x1f   :  { %35 = vst [vmem:[%s57_s1] sm:$0xff] %v34_v17 }

</bundles_post_ra>
